<compile_context>
chip_gen: v6e
topology: v6e:2x2x1
jax: 0.10.0
libtpu: 0.0.40
codegen_flags: <defaults>
</compile_context>

<pallas_src>
import functools

import jax
import jax.numpy as jnp
from jax.experimental import pallas as pl
from jax.experimental.pallas import tpu as pltpu

_BN_EPS = 1e-5
_VMEM_LIMIT = 32 * 1024 * 1024


def _stats_kernel(x_ref, w1_ref, b1_ref, sum_ref, sumsq_ref, *, n_valid, tile_n):
    """Pass 1: h = relu(W1 @ x_tile^T + b1) feature-major; accumulate sum / sum^2."""
    i = pl.program_id(0)

    @pl.when(i == 0)
    def _():
        sum_ref[...] = jnp.zeros_like(sum_ref)
        sumsq_ref[...] = jnp.zeros_like(sumsq_ref)

    # (H, TN) = (H, D) x (TN, D), contracting last dims -> no in-kernel transpose.
    h = jax.lax.dot_general(
        w1_ref[...], x_ref[...],
        dimension_numbers=(((1,), (1,)), ((), ())),
        preferred_element_type=jnp.float32,
    ) + b1_ref[...]
    h = jnp.maximum(h, 0.0)

    if n_valid % tile_n != 0:
        # Zero the zero-padded batch columns so they don't pollute the statistics.
        col = jax.lax.broadcasted_iota(jnp.int32, h.shape, 1) + i * tile_n
        h = jnp.where(col < n_valid, h, 0.0)

    sum_ref[...] += jnp.sum(h, axis=1, keepdims=True)        # (H, 1)
    sumsq_ref[...] += jnp.sum(h * h, axis=1, keepdims=True)  # (H, 1)


def _fwd_kernel(sum_ref, sumsq_ref, x_ref, w1_ref, b1_ref, gamma_ref, beta_ref,
                w2_ref, b2_ref, o_ref, *, inv_n):
    """Pass 2: recompute linear1+relu, fused BatchNorm (batch stats) + linear2."""
    # Batch statistics -> per-feature affine:  bn(h) = h * a + c
    mean = sum_ref[...] * inv_n                              # (H, 1)
    var = sumsq_ref[...] * inv_n - mean * mean               # biased var, E[h^2]-E[h]^2
    a = gamma_ref[...] * jax.lax.rsqrt(var + _BN_EPS)        # (H, 1)
    c = beta_ref[...] - mean * a                             # (H, 1)

    # Fold linear2 into the BN affine:
    #   out[n] = sum_j (h[j,n]*a[j] + c[j]) * w2[j] + b2
    #          = sum_j h[j,n] * (a[j]*w2[j])  +  (sum_j c[j]*w2[j] + b2)
    aw = a * w2_ref[...]                                     # (H, 1)
    bias = jnp.sum(c * w2_ref[...]) + b2_ref[0, 0]           # scalar (b2 in SMEM)

    h = jax.lax.dot_general(
        w1_ref[...], x_ref[...],
        dimension_numbers=(((1,), (1,)), ((), ())),
        preferred_element_type=jnp.float32,
    ) + b1_ref[...]
    h = jnp.maximum(h, 0.0)                                  # (H, TN)

    # linear2 as VPU multiply + sublane reduce -> lane-dense (1, TN) store.
    o_ref[...] = (jnp.sum(h * aw, axis=0, keepdims=True) + bias).astype(o_ref.dtype)


def nn_forward(x, w1, b1, w2, b2, gamma, beta, *, tile_n=256):
    N, D = x.shape
    H = w1.shape[0]

    # Row tile: multiple of 8 sublanes; pad the batch up to whole tiles.
    tile_n = max(8, (tile_n // 8) * 8)
    tn = min(tile_n, -(-N // 8) * 8)
    n_pad = -(-N // tn) * tn
    if n_pad != N:
        x = jnp.pad(x, ((0, n_pad - N), (0, 0)))
    n_tiles = n_pad // tn

    # Small params as (H, 1) columns (feature-major layout); b2 as an SMEM scalar.
    b1_c = b1.reshape(H, 1).astype(jnp.float32)
    gamma_c = gamma.reshape(H, 1).astype(jnp.float32)
    beta_c = beta.reshape(H, 1).astype(jnp.float32)
    w2_c = w2.reshape(H, 1).astype(jnp.float32)
    b2_s = b2.reshape(1, 1).astype(jnp.float32)

    rep = lambda shape: pl.BlockSpec(shape, lambda i: (0, 0))   # replicated block
    x_spec = pl.BlockSpec((tn, D), lambda i: (i, 0))

    params_arbitrary = pltpu.CompilerParams(
        dimension_semantics=("arbitrary",), vmem_limit_bytes=_VMEM_LIMIT)
    params_parallel = pltpu.CompilerParams(
        dimension_semantics=("parallel",), vmem_limit_bytes=_VMEM_LIMIT)

    # ---- pass 1: per-feature sum / sum-of-squares over the batch (reduction) ----
    sum_h, sumsq_h = pl.pallas_call(
        functools.partial(_stats_kernel, n_valid=N, tile_n=tn),
        grid=(n_tiles,),
        in_specs=[x_spec, rep((H, D)), rep((H, 1))],
        out_specs=(rep((H, 1)), rep((H, 1))),
        out_shape=(jax.ShapeDtypeStruct((H, 1), jnp.float32),
                   jax.ShapeDtypeStruct((H, 1), jnp.float32)),
        compiler_params=params_arbitrary,
    )(x, w1, b1_c)

    # ---- pass 2: recompute linear1+relu, normalize + linear2 (fused, parallel) ----
    out_row = pl.pallas_call(
        functools.partial(_fwd_kernel, inv_n=1.0 / float(N)),
        grid=(n_tiles,),
        in_specs=[
            rep((H, 1)),                                        # sum
            rep((H, 1)),                                        # sum of squares
            x_spec,                                             # x tile
            rep((H, D)),                                        # W1
            rep((H, 1)),                                        # b1
            rep((H, 1)),                                        # gamma
            rep((H, 1)),                                        # beta
            rep((H, 1)),                                        # W2 (as column)
            pl.BlockSpec(memory_space=pltpu.MemorySpace.SMEM),  # b2 scalar
        ],
        out_specs=pl.BlockSpec((1, tn), lambda i: (0, i)),      # lane-dense output
        out_shape=jax.ShapeDtypeStruct((1, n_pad), jnp.float32),
        compiler_params=params_parallel,
    )(sum_h, sumsq_h, x, w1, b1_c, gamma_c, beta_c, w2_c, b2_s)

    return out_row[0, :N].reshape(N, 1)


def init_params(key, D, hidden):
    """Deterministic param init mirroring nn.Linear / nn.BatchNorm1d shapes."""
    k1, k2, k3, k4 = jax.random.split(key, 4)
    bound1 = 1.0 / jnp.sqrt(D)
    w1 = jax.random.uniform(k1, (hidden, D), jnp.float32, -bound1, bound1)
    b1 = jax.random.uniform(k2, (hidden,), jnp.float32, -bound1, bound1)
    bound2 = 1.0 / jnp.sqrt(hidden)
    w2 = jax.random.uniform(k3, (1, hidden), jnp.float32, -bound2, bound2)
    b2 = jax.random.uniform(k4, (1,), jnp.float32, -bound2, bound2)
    gamma = jnp.ones((hidden,), jnp.float32)   # BatchNorm1d weight init
    beta = jnp.zeros((hidden,), jnp.float32)   # BatchNorm1d bias init
    return w1, b1, w2, b2, gamma, beta


def reference_forward(x, w1, b1, w2, b2, gamma, beta):
    h = x @ w1.T + b1
    h = jnp.maximum(h, 0.0)
    mean = jnp.mean(h, axis=0, keepdims=True)
    var = jnp.mean((h - mean) ** 2, axis=0, keepdims=True)
    h = (h - mean) / jnp.sqrt(var + _BN_EPS) * gamma + beta
    return h @ w2.T + b2


if __name__ == "__main__":
    D, hidden = 16, 32
    key = jax.random.PRNGKey(0)
    kx1, kx2, kp = jax.random.split(key, 3)
    w1, b1, w2, b2, gamma, beta = init_params(kp, D, hidden)

    # Case 1: tile-aligned batch (grid of 2 row tiles of 256).
    N1 = 512
    x1 = jax.random.normal(kx1, (N1, D), jnp.float32)
    out1 = jax.block_until_ready(nn_forward(x1, w1, b1, w2, b2, gamma, beta))
    ref1 = reference_forward(x1, w1, b1, w2, b2, gamma, beta)
    assert out1.shape == (N1, 1), out1.shape
    assert jnp.allclose(out1, ref1, atol=5e-4, rtol=5e-4), \
        float(jnp.max(jnp.abs(out1 - ref1)))

    # Case 2: ragged batch (exercises zero-padding + masked BN statistics).
    N2 = 300
    x2 = jax.random.normal(kx2, (N2, D), jnp.float32)
    out2 = jax.block_until_ready(nn_forward(x2, w1, b1, w2, b2, gamma, beta))
    ref2 = reference_forward(x2, w1, b1, w2, b2, gamma, beta)
    assert out2.shape == (N2, 1), out2.shape
    assert jnp.allclose(out2, ref2, atol=5e-4, rtol=5e-4), \
        float(jnp.max(jnp.abs(out2 - ref2)))

    print("KERNEL_OK")
</pallas_src>

<mosaic_0001>
module attributes {stable_mosaic.version = 11 : i64} {
  func.func @_stats_kernel(%arg0: i32, %arg1: memref<256x16xf32, #tpu.memory_space<vmem>>, %arg2: memref<32x16xf32, #tpu.memory_space<vmem>>, %arg3: memref<32x1xf32, #tpu.memory_space<vmem>>, %arg4: memref<32x1xf32, #tpu.memory_space<vmem>>, %arg5: memref<32x1xf32, #tpu.memory_space<vmem>>) attributes {dimension_semantics = [#tpu.dimension_semantics<arbitrary>], iteration_bounds = array<i64: 2>, scalar_prefetch = 0 : i64, scratch_operands = 0 : i64, tpu.core_type = #tpu.core_type<tc>, window_params = [{transform_indices = @transform_0, window_bounds = array<i64: 256, 16>}, {pipeline_mode = #tpu.pipeline_mode<synchronous>, transform_indices = @transform_1, window_bounds = array<i64: 32, 16>}, {pipeline_mode = #tpu.pipeline_mode<synchronous>, transform_indices = @transform_2, window_bounds = array<i64: 32, 1>}, {pipeline_mode = #tpu.pipeline_mode<synchronous>, transform_indices = @transform_3, window_bounds = array<i64: 32, 1>}, {pipeline_mode = #tpu.pipeline_mode<synchronous>, transform_indices = @transform_4, window_bounds = array<i64: 32, 1>}]} {
    %c0_i32 = arith.constant 0 : i32
    %0 = arith.cmpi eq, %arg0, %c0_i32 : i32
    %1 = arith.extui %0 : i1 to i32
    %c0_i32_0 = arith.constant 0 : i32
    %2 = arith.cmpi ne, %1, %c0_i32_0 : i32
    scf.if %2 {
      %cst_17 = arith.constant 0.000000e+00 : f32
      %22 = vector.broadcast %cst_17 : f32 to vector<32x1xf32>
      %c0_18 = arith.constant 0 : index
      %c0_19 = arith.constant 0 : index
      %23 = vector.load %arg4[%c0_18, %c0_19] : memref<32x1xf32, #tpu.memory_space<vmem>>, vector<32x1xf32>
      tpu.vector_store %arg4[%c0_18, %c0_19], %22 {strides = array<i32>} : memref<32x1xf32, #tpu.memory_space<vmem>>, vector<32x1xf32>,
      %cst_20 = arith.constant 0.000000e+00 : f32
      %24 = vector.broadcast %cst_20 : f32 to vector<32x1xf32>
      %c0_21 = arith.constant 0 : index
      %c0_22 = arith.constant 0 : index
      %25 = vector.load %arg5[%c0_21, %c0_22] : memref<32x1xf32, #tpu.memory_space<vmem>>, vector<32x1xf32>
      tpu.vector_store %arg5[%c0_21, %c0_22], %24 {strides = array<i32>} : memref<32x1xf32, #tpu.memory_space<vmem>>, vector<32x1xf32>,
    } else {
    }
    %c0 = arith.constant 0 : index
    %c0_1 = arith.constant 0 : index
    %3 = vector.load %arg2[%c0, %c0_1] : memref<32x16xf32, #tpu.memory_space<vmem>>, vector<32x16xf32>
    %c0_2 = arith.constant 0 : index
    %c0_3 = arith.constant 0 : index
    %4 = vector.load %arg1[%c0_2, %c0_3] : memref<256x16xf32, #tpu.memory_space<vmem>>, vector<256x16xf32>
    %cst = arith.constant dense<0.000000e+00> : vector<32x256xf32>
    %5 = tpu.matmul %3, %4, %cst {dimension_numbers = #tpu.dot_dimension_numbers<[1], [1], [0], [0], [0, 0, 1, 0], [], []>} : vector<32x16xf32>, vector<256x16xf32>, vector<32x256xf32> -> vector<32x256xf32>
    %c0_4 = arith.constant 0 : index
    %c0_5 = arith.constant 0 : index
    %6 = vector.load %arg3[%c0_4, %c0_5] : memref<32x1xf32, #tpu.memory_space<vmem>>, vector<32x1xf32>
    %7 = vector.broadcast %6 : vector<32x1xf32> to vector<32x256xf32>
    %8 = arith.addf %5, %7 : vector<32x256xf32>
    %cst_6 = arith.constant 0.000000e+00 : f32
    %9 = vector.broadcast %cst_6 : f32 to vector<32x256xf32>
    %10 = arith.maximumf %8, %9 : vector<32x256xf32>
    %c0_7 = arith.constant 0 : index
    %c0_8 = arith.constant 0 : index
    %11 = vector.load %arg4[%c0_7, %c0_8] : memref<32x1xf32, #tpu.memory_space<vmem>>, vector<32x1xf32>
    %cst_9 = arith.constant dense<0.000000e+00> : vector<32xf32>
    %12 = vector.multi_reduction <add>, %10, %cst_9 [1] : vector<32x256xf32> to vector<32xf32>
    %13 = vector.shape_cast %12 : vector<32xf32> to vector<32x1xf32>
    %14 = arith.addf %11, %13 : vector<32x1xf32>
    %c0_10 = arith.constant 0 : index
    %c0_11 = arith.constant 0 : index
    %15 = vector.load %arg4[%c0_10, %c0_11] : memref<32x1xf32, #tpu.memory_space<vmem>>, vector<32x1xf32>
    tpu.vector_store %arg4[%c0_10, %c0_11], %14 {strides = array<i32>} : memref<32x1xf32, #tpu.memory_space<vmem>>, vector<32x1xf32>,
    %c0_12 = arith.constant 0 : index
    %c0_13 = arith.constant 0 : index
    %16 = vector.load %arg5[%c0_12, %c0_13] : memref<32x1xf32, #tpu.memory_space<vmem>>, vector<32x1xf32>
    %17 = arith.mulf %10, %10 : vector<32x256xf32>
    %cst_14 = arith.constant dense<0.000000e+00> : vector<32xf32>
    %18 = vector.multi_reduction <add>, %17, %cst_14 [1] : vector<32x256xf32> to vector<32xf32>
    %19 = vector.shape_cast %18 : vector<32xf32> to vector<32x1xf32>
    %20 = arith.addf %16, %19 : vector<32x1xf32>
    %c0_15 = arith.constant 0 : index
    %c0_16 = arith.constant 0 : index
    %21 = vector.load %arg5[%c0_15, %c0_16] : memref<32x1xf32, #tpu.memory_space<vmem>>, vector<32x1xf32>
    tpu.vector_store %arg5[%c0_15, %c0_16], %20 {strides = array<i32>} : memref<32x1xf32, #tpu.memory_space<vmem>>, vector<32x1xf32>,
    return
  }
  func.func @transform_0(%arg0: i32) -> (i32, i32) {
    %c0_i32 = arith.constant 0 : i32
    %c0_i32_0 = arith.constant 0 : i32
    return %arg0, %c0_i32 : i32, i32
  }
  func.func @transform_1(%arg0: i32) -> (i32, i32) {
    %c0_i32 = arith.constant 0 : i32
    %c0_i32_0 = arith.constant 0 : i32
    %c0_i32_1 = arith.constant 0 : i32
    return %c0_i32, %c0_i32_0 : i32, i32
  }
  func.func @transform_2(%arg0: i32) -> (i32, i32) {
    %c0_i32 = arith.constant 0 : i32
    %c0_i32_0 = arith.constant 0 : i32
    %c0_i32_1 = arith.constant 0 : i32
    return %c0_i32, %c0_i32_0 : i32, i32
  }
  func.func @transform_3(%arg0: i32) -> (i32, i32) {
    %c0_i32 = arith.constant 0 : i32
    %c0_i32_0 = arith.constant 0 : i32
    %c0_i32_1 = arith.constant 0 : i32
    return %c0_i32, %c0_i32_0 : i32, i32
  }
  func.func @transform_4(%arg0: i32) -> (i32, i32) {
    %c0_i32 = arith.constant 0 : i32
    %c0_i32_0 = arith.constant 0 : i32
    %c0_i32_1 = arith.constant 0 : i32
    return %c0_i32, %c0_i32_0 : i32, i32
  }
}

</mosaic_0001>

<bundles_post_ra>
// kernel: tpu_custom_call.1
= control target key start
LH: loop header
LB: loop body
LE: loop exit
PB: predicated region body
PF: predicated region fallthrough
CT: control target
= control target key end

     0   :  { %s717_s15 = smov 0   ;;  %s949_s0 = inlined_call_operand.vmem [shape: f32[512,16], index: 0, kind: input, shape index: {}]   ;;  %s950_s1 = inlined_call_operand.vmem [shape: f32[32,16], index: 1, kind: input, shape index: {}]   ;;  %s951_s2 = inlined_call_operand.vmem [shape: f32[32,1], index: 2, kind: input, shape index: {}]   ;;  %s952_s3 = inlined_call_operand.vmem [shape: f32[32,1], index: 3, kind: output, shape index: {0}]   ;;  %s953_s4 = inlined_call_operand.vmem [shape: f32[32,1], index: 4, kind: output, shape index: {1}]  }
   0x1 LB: > { %s553_s16 = sadd.s32 4294967295, %s688_s15   ;;  %p556_p0 = scmp.ge.s32.totalorder %s688_s15, 1  ;;  %s688_s15 = sphi %s717_s15, %s15_s15  }
   0x2   : > { %p156_p1 = scmp.lt.s32.totalorder %s688_s15, 3 }
   0x4   : > { %p157_p2 = pnand %p556_p0, %p156_p1 }
   0x5   : > { %s557_s17 = sshll.u32 (!%p157_p2), %s553_s16, 5  ;;  %p559_p4 = scmp.ne.s32.totalorder (!%p157_p2), %s553_s16, 0 }
   0x6   : > { %160 = sbr.rel (%p157_p2) target bundleno = 444 (0x1bc), region = 32  ;;  %p178_p3 = scmp.lt.s32.totalorder (!%p157_p2), %s557_s17, 63 }
   0xb   : > { %s955_s17 = smov (!%p178_p3, %s557_s17), 63  ;;  %186 = sbr.rel (%p559_p4) target bundleno = 21 (0x15), region = 36 }
   0xc   : > { %s558_s18 = sshll.u32 %s955_s17, 3 }
   0xd   : > { %s728_s21 = scalar_lea.vmem %s949_s0, %s558_s18 }
  0x10   : > { %vm187_vm0 = vcmask 7168   ;;  %v690_v0 = vmov 0.0  }
  0x11   : > { %188 = vst.msk [vmem:[%s952_s3] sm:$0xff] %vm187_vm0, %v690_v0  ;;  %189 = vst.msk [vmem:[%s952_s3 + $0x8] sm:$0xff] %vm187_vm0, %v690_v0 }
  0x12   : > { %190 = vst.msk [vmem:[%s952_s3 + $0x10] sm:$0xff] %vm187_vm0, %v690_v0  ;;  %191 = vst.msk [vmem:[%s952_s3 + $0x18] sm:$0xff] %vm187_vm0, %v690_v0 }
  0x13   : > { %192 = vst.msk [vmem:[%s953_s4] sm:$0xff] %vm187_vm0, %v690_v0  ;;  %193 = vst.msk [vmem:[%s953_s4 + $0x8] sm:$0xff] %vm187_vm0, %v690_v0 }
  0x14   : > { %194 = vst.msk [vmem:[%s953_s4 + $0x10] sm:$0xff] %vm187_vm0, %v690_v0  ;;  %195 = vst.msk [vmem:[%s953_s4 + $0x18] sm:$0xff] %vm187_vm0, %v690_v0 }
  0x15 PF: > { %v231_v1 = vld [vmem:[%s728_s21 + $0xf8] sm:$0xff]  ;;  %vm256_vm1 = vcmask 130048   ;;  %v230_v3 = vld [vmem:[%s728_s21 + $0xf0] sm:$0xff]  ;;  %v229_v5 = vld [vmem:[%s728_s21 + $0xe8] sm:$0xff]  ;;  %v691_v6 = vmov 0   ;;  %vm482_vm2 = vcmask 7168  }
  0x16   : > { %v215_v2 = vld [vmem:[%s728_s21 + $0x78] sm:$0xff]  ;;  %598 = vmatprep.subr.msk.mxu0 %vm256_vm1, %v231_v1  ;;  %638 = vmatprep.subr.msk.mxu1 %vm256_vm1, %v231_v1  ;;  %v214_v4 = vld [vmem:[%s728_s21 + $0x70] sm:$0xff]  ;;  %v213_v7 = vld [vmem:[%s728_s21 + $0x68] sm:$0xff] }
  0x17   : > { %599 = vmatpush3.xpose.msk.msra.mxu0 %vm256_vm1, %v215_v2  ;;  %654 = vmatpush3.xpose.msk.msra.mxu1 %vm256_vm1, %v215_v2  ;;  %v228_v8 = vld [vmem:[%s728_s21 + $0xe0] sm:$0xff]  ;;  %v784_v11 = vld [vmem:[%s950_s1 + $0x10] sm:$0xff]  ;;  %v227_v12 = vld [vmem:[%s728_s21 + $0xd8] sm:$0xff] }
  0x18   : > { %600 = vmatprep.subr.msk.mxu0 %vm256_vm1, %v230_v3  ;;  %639 = vmatprep.subr.msk.mxu1 %vm256_vm1, %v230_v3  ;;  %v776_v9 = vld [vmem:[%s950_s1] sm:$0xff]  ;;  %v234_v14 = vld [vmem:[%s951_s2 + $0x10] sm:$0xff]  ;;  %v233_v15 = vld [vmem:[%s951_s2 + $0x8] sm:$0xff] }
  0x19   : > { %680 = vset.pattern.permute.xlu0 %v691_v6  ;;  %681 = vset.pattern.permute.xlu1 %v691_v6  ;;  %v212_v10 = vld [vmem:[%s728_s21 + $0x60] sm:$0xff]  ;;  %v235_v16 = vld [vmem:[%s951_s2 + $0x18] sm:$0xff]  ;;  %v226_v18 = vld [vmem:[%s728_s21 + $0xd0] sm:$0xff] }
  0x1a   : > { %630 = vmatprep.mubr.msk.f32.mxu0 %vm256_vm1, %v776_v9  ;;  %634 = vmatprep.mubr.msk.f32.mxu1 %vm256_vm1, %v784_v11  ;;  %v232_v13 = vld [vmem:[%s951_s2] sm:$0xff]  ;;  %v211_v17 = vld [vmem:[%s728_s21 + $0x58] sm:$0xff]  ;;  %v210_v19 = vld [vmem:[%s728_s21 + $0x50] sm:$0xff] }
  0x1b   : > { %601 = vmatpush3.xpose.msk.msra.mxu0 %vm256_vm1, %v214_v4  ;;  %655 = vmatpush3.xpose.msk.msra.mxu1 %vm256_vm1, %v214_v4  ;;  %v225_v20 = vld [vmem:[%s728_s21 + $0xc8] sm:$0xff]  ;;  %v224_v22 = vld [vmem:[%s728_s21 + $0xc0] sm:$0xff]  ;;  %v223_v24 = vld [vmem:[%s728_s21 + $0xb8] sm:$0xff] }
  0x1c   : > { %602 = vmatprep.subr.msk.mxu0 %vm256_vm1, %v229_v5  ;;  %640 = vmatprep.subr.msk.mxu1 %vm256_vm1, %v229_v5  ;;  %v209_v21 = vld [vmem:[%s728_s21 + $0x48] sm:$0xff]  ;;  %v208_v23 = vld [vmem:[%s728_s21 + $0x40] sm:$0xff]  ;;  %v207_v25 = vld [vmem:[%s728_s21 + $0x38] sm:$0xff] }
  0x1d   : > { %238 = vperm.xlu0 %680, %v232_v13   ;;  %248 = vperm.xlu1 %681, %v234_v14   ;;  %v222_v26 = vld [vmem:[%s728_s21 + $0xb0] sm:$0xff]  ;;  %v221_v28 = vld [vmem:[%s728_s21 + $0xa8] sm:$0xff]  ;;  %v220_v30 = vld [vmem:[%s728_s21 + $0xa0] sm:$0xff] }
  0x1e   : > { %v206_v27 = vld [vmem:[%s728_s21 + $0x30] sm:$0xff]  ;;  %v205_v29 = vld [vmem:[%s728_s21 + $0x28] sm:$0xff]  ;;  %v204_v31 = vld [vmem:[%s728_s21 + $0x20] sm:$0xff] }
  0x1f   : > { %603 = vmatpush3.xpose.msk.msra.mxu0 %vm256_vm1, %v213_v7  ;;  %656 = vmatpush3.xpose.msk.msra.mxu1 %vm256_vm1, %v213_v7  ;;  %v219_v32 = vld [vmem:[%s728_s21 + $0x98] sm:$0xff]  ;;  %v218_v34 = vld [vmem:[%s728_s21 + $0x90] sm:$0xff]  ;;  %v217_v36 = vld [vmem:[%s728_s21 + $0x88] sm:$0xff] }
  0x20   : > { %604 = vmatprep.subr.msk.mxu0 %vm256_vm1, %v228_v8  ;;  %641 = vmatprep.subr.msk.mxu1 %vm256_vm1, %v228_v8  ;;  %v203_v33 = vld [vmem:[%s728_s21 + $0x18] sm:$0xff]  ;;  %v202_v35 = vld [vmem:[%s728_s21 + $0x10] sm:$0xff]  ;;  %v201_v37 = vld [vmem:[%s728_s21 + $0x8] sm:$0xff] }
  0x21   : > { %243 = vperm.xlu0 %680, %v233_v15   ;;  %253 = vperm.xlu1 %681, %v235_v16   ;;  %v216_v38 = vld [vmem:[%s728_s21 + $0x80] sm:$0xff]  ;;  %v197_v40 = vld [vmem:[%s950_s1 + $0x8] sm:$0xff]  ;;  %v199_v41 = vld [vmem:[%s950_s1 + $0x18] sm:$0xff] }
  0x22   : > { %v200_v39 = vld [vmem:[%s728_s21] sm:$0xff] }
  0x23   : > { %605 = vmatpush3.xpose.msk.msra.mxu0 %vm256_vm1, %v212_v10  ;;  %657 = vmatpush3.xpose.msk.msra.mxu1 %vm256_vm1, %v212_v10 }
  0x24   : > { %606 = vmatprep.subr.msk.mxu0 %vm256_vm1, %v227_v12  ;;  %642 = vmatprep.subr.msk.mxu1 %vm256_vm1, %v227_v12 }
  0x27   : > { %607 = vmatpush3.xpose.msk.msra.mxu0 %vm256_vm1, %v211_v17  ;;  %658 = vmatpush3.xpose.msk.msra.mxu1 %vm256_vm1, %v211_v17 }
  0x28   : > { %608 = vmatprep.subr.msk.mxu0 %vm256_vm1, %v226_v18  ;;  %643 = vmatprep.subr.msk.mxu1 %vm256_vm1, %v226_v18 }
  0x2b   : > { %609 = vmatpush3.xpose.msk.msra.mxu0 %vm256_vm1, %v210_v19  ;;  %659 = vmatpush3.xpose.msk.msra.mxu1 %vm256_vm1, %v210_v19 }
  0x2c   : > { %610 = vmatprep.subr.msk.mxu0 %vm256_vm1, %v225_v20  ;;  %644 = vmatprep.subr.msk.mxu1 %vm256_vm1, %v225_v20 }
  0x2f   : > { %611 = vmatpush3.xpose.msk.msra.mxu0 %vm256_vm1, %v209_v21  ;;  %660 = vmatpush3.xpose.msk.msra.mxu1 %vm256_vm1, %v209_v21 }
  0x30   : > { %612 = vmatprep.subr.msk.mxu0 %vm256_vm1, %v224_v22  ;;  %645 = vmatprep.subr.msk.mxu1 %vm256_vm1, %v224_v22  ;;  %v462_v22 = vld [vmem:[%s952_s3] sm:$0xff] }
  0x33   : > { %613 = vmatpush3.xpose.msk.msra.mxu0 %vm256_vm1, %v208_v23  ;;  %661 = vmatpush3.xpose.msk.msra.mxu1 %vm256_vm1, %v208_v23  ;;  %v487_v23 = vld [vmem:[%s953_s4] sm:$0xff] }
  0x34   : > { %614 = vmatprep.subr.msk.mxu0 %vm256_vm1, %v223_v24  ;;  %646 = vmatprep.subr.msk.mxu1 %vm256_vm1, %v223_v24 }
  0x37   : > { %615 = vmatpush3.xpose.msk.msra.mxu0 %vm256_vm1, %v207_v25  ;;  %662 = vmatpush3.xpose.msk.msra.mxu1 %vm256_vm1, %v207_v25 }
  0x38   : > { %616 = vmatprep.subr.msk.mxu0 %vm256_vm1, %v222_v26  ;;  %647 = vmatprep.subr.msk.mxu1 %vm256_vm1, %v222_v26 }
  0x3b   : > { %617 = vmatpush3.xpose.msk.msra.mxu0 %vm256_vm1, %v206_v27  ;;  %663 = vmatpush3.xpose.msk.msra.mxu1 %vm256_vm1, %v206_v27 }
  0x3c   : > { %618 = vmatprep.subr.msk.mxu0 %vm256_vm1, %v221_v28  ;;  %648 = vmatprep.subr.msk.mxu1 %vm256_vm1, %v221_v28  ;;  %v464_v28 = vld [vmem:[%s952_s3 + $0x10] sm:$0xff] }
  0x3f   : > { %619 = vmatpush3.xpose.msk.msra.mxu0 %vm256_vm1, %v205_v29  ;;  %664 = vmatpush3.xpose.msk.msra.mxu1 %vm256_vm1, %v205_v29  ;;  %v463_v29 = vld [vmem:[%s952_s3 + $0x8] sm:$0xff] }
  0x40   : > { %620 = vmatprep.subr.msk.mxu0 %vm256_vm1, %v220_v30  ;;  %649 = vmatprep.subr.msk.mxu1 %vm256_vm1, %v220_v30 }
  0x43   : > { %621 = vmatpush3.xpose.msk.msra.mxu0 %vm256_vm1, %v204_v31  ;;  %665 = vmatpush3.xpose.msk.msra.mxu1 %vm256_vm1, %v204_v31 }
  0x44   : > { %622 = vmatprep.subr.msk.mxu0 %vm256_vm1, %v219_v32  ;;  %650 = vmatprep.subr.msk.mxu1 %vm256_vm1, %v219_v32 }
  0x47   : > { %623 = vmatpush3.xpose.msk.msra.mxu0 %vm256_vm1, %v203_v33  ;;  %666 = vmatpush3.xpose.msk.msra.mxu1 %vm256_vm1, %v203_v33 }
  0x48   : > { %624 = vmatprep.subr.msk.mxu0 %vm256_vm1, %v218_v34  ;;  %651 = vmatprep.subr.msk.mxu1 %vm256_vm1, %v218_v34  ;;  %v465_v34 = vld [vmem:[%s952_s3 + $0x18] sm:$0xff] }
  0x4b   : > { %625 = vmatpush3.xpose.msk.msra.mxu0 %vm256_vm1, %v202_v35  ;;  %667 = vmatpush3.xpose.msk.msra.mxu1 %vm256_vm1, %v202_v35  ;;  %v489_v35 = vld [vmem:[%s953_s4 + $0x10] sm:$0xff] }
  0x4c   : > { %626 = vmatprep.subr.msk.mxu0 %vm256_vm1, %v217_v36  ;;  %652 = vmatprep.subr.msk.mxu1 %vm256_vm1, %v217_v36 }
  0x4f   : > { %627 = vmatpush3.xpose.msk.msra.mxu0 %vm256_vm1, %v201_v37  ;;  %668 = vmatpush3.xpose.msk.msra.mxu1 %vm256_vm1, %v201_v37 }
  0x50   : > { %628 = vmatprep.subr.msk.mxu0 %vm256_vm1, %v216_v38  ;;  %653 = vmatprep.subr.msk.mxu1 %vm256_vm1, %v216_v38 }
  0x53   : > { %629 = vmatpush3.xpose.msk.msra.mxu0 %vm256_vm1, %v200_v39  ;;  %669 = vmatpush3.xpose.msk.msra.mxu1 %vm256_vm1, %v200_v39 }
  0x56   : > { %631 = vmatmul.mubr.msk.f32.vlgmr.msra.gmra.mxu0 %vm256_vm1, %v776_v9  ;;  %635 = vmatmul.mubr.msk.f32.vlgmr.msra.gmra.mxu1 %vm256_vm1, %v784_v11 }
  0x57   : > { %632 = vmatprep.mubr.msk.f32.mxu0 %vm256_vm1, %v197_v40  ;;  %636 = vmatprep.mubr.msk.f32.mxu1 %vm256_vm1, %v199_v41 }
  0x5a   : > { %633 = vmatmul.mubr.msk.f32.gmra.mxu0 %vm256_vm1, %v197_v40  ;;  %637 = vmatmul.mubr.msk.f32.gmra.mxu1 %vm256_vm1, %v199_v41  ;;  %v488_v40 = vld [vmem:[%s953_s4 + $0x8] sm:$0xff] }
  0x98   : > { %v239_v42 = vpop.permute.xlu0 %238  ;;  %v249_v43 = vpop.permute.xlu1 %248 }
  0x9c   : > { %v244_v55 = vpop.permute.xlu0 %243  ;;  %v254_v57 = vpop.permute.xlu1 %253 }
 0x116   : > { %v431_v44 = vpop.f32.mrf.mxu0  ;;  %v443_v45 = vpop.f32.mrf.mxu1 }
 0x117   : > { %v432_v46 = vadd.f32 %v431_v44, %v239_v42  ;;  %v444_v47 = vadd.f32 %v443_v45, %v249_v43 }
 0x118   : > { %v433_v48 = vpop.f32.mrf.mxu0  ;;  %v445_v49 = vpop.f32.mrf.mxu1 }
 0x119   : > { %v454_v50 = vmax.f32 %v432_v46, 0.0  ;;  %v434_v51 = vadd.f32 %v433_v48, %v239_v42  ;;  %v446_v52 = vadd.f32 %v445_v49, %v249_v43  ;;  %v458_v58 = vmax.f32 %v444_v47, 0.0  ;;  %v490_v43 = vld [vmem:[%s953_s4 + $0x18] sm:$0xff] }
 0x11a   : > { %v437_v53 = vpop.f32.mrf.mxu0  ;;  %v449_v54 = vpop.f32.mrf.mxu1 }
 0x11b   : > { %v455_v56 = vmax.f32 %v434_v51, 0.0  ;;  %v491_v61 = vmul.f32 %v454_v50, %v454_v50  ;;  %v438_v63 = vadd.f32 %v437_v53, %v244_v55  ;;  %v459_v1 = vmax.f32 %v446_v52, 0.0 }
 0x11c   : > { %v439_v59 = vpop.f32.mrf.mxu0  ;;  %v451_v60 = vpop.f32.mrf.mxu1  ;;  %v450_v2 = vadd.f32 %v449_v54, %v254_v57  ;;  %v495_v13 = vmul.f32 %v458_v58, %v458_v58 }
 0x11d   : > { %v492_v62 = vmul.f32 %v455_v56, %v455_v56  ;;  %v440_v0 = vadd.f32 %v439_v59, %v244_v55  ;;  %v452_v3 = vadd.f32 %v451_v60, %v254_v57  ;;  %v466_v4 = vadd.f32 %v455_v56, %v454_v50 }
 0x11e   : > { %v456_v7 = vmax.f32 %v438_v63, 0.0  ;;  %v460_v8 = vmax.f32 %v450_v2, 0.0  ;;  %v472_v10 = vadd.f32 %v459_v1, %v458_v58  ;;  %v496_v11 = vmul.f32 %v459_v1, %v459_v1 }
 0x11f   : > { %v457_v5 = vmax.f32 %v440_v0, 0.0  ;;  %v499_v6 = vadd.f32 %v492_v62, %v491_v61  ;;  %467 = vadd.xlane.f32.xlu0 %v466_v4  ;;  %v461_v9 = vmax.f32 %v452_v3, 0.0 }
 0x120   : > { %v505_v16 = vadd.f32 %v496_v11, %v495_v13  ;;  %v493_v17 = vmul.f32 %v456_v7, %v456_v7  ;;  %v497_v20 = vmul.f32 %v460_v8, %v460_v8 }
 0x121   : > { %500 = vadd.xlane.f32.xlu1 %v499_v6  ;;  %v469_v12 = vadd.f32 %v457_v5, %v456_v7  ;;  %v494_v14 = vmul.f32 %v457_v5, %v457_v5  ;;  %v475_v15 = vadd.f32 %v461_v9, %v460_v8  ;;  %v498_v18 = vmul.f32 %v461_v9, %v461_v9 }
 0x123   : > { %473 = vadd.xlane.f32.xlu0 %v472_v10  ;;  %v502_v19 = vadd.f32 %v494_v14, %v493_v17  ;;  %v508_v21 = vadd.f32 %v498_v18, %v497_v20 }
 0x125   : > { %470 = vadd.xlane.f32.xlu1 %v469_v12 }
 0x127   : > { %476 = vadd.xlane.f32.xlu0 %v475_v15 }
 0x129   : > { %506 = vadd.xlane.f32.xlu1 %v505_v16 }
 0x12b   : > { %503 = vadd.xlane.f32.xlu0 %v502_v19 }
 0x12f   : > { %509 = vadd.xlane.f32.xlu0 %v508_v21 }
 0x1a8   : > { %v468_v24 = vpop.xlane.xlu0 %467 }
 0x1a9   : > { %v478_v25 = vadd.f32 %v468_v24, %v462_v22 }
 0x1aa   : > { %v501_v26 = vpop.xlane.xlu1 %500 }
 0x1ab   : > { %v511_v27 = vadd.f32 %v501_v26, %v487_v23  ;;  %483 = vst.msk [vmem:[%s952_s3] sm:$0xff] %vm482_vm2, %v478_v25 }
 0x1ac   : > { %v474_v30 = vpop.xlane.xlu0 %473 }
 0x1ad   : > { %515 = vst.msk [vmem:[%s953_s4] sm:$0xff] %vm482_vm2, %v511_v27  ;;  %v480_v31 = vadd.f32 %v474_v30, %v464_v28 }
 0x1ae   : > { %v471_v32 = vpop.xlane.xlu1 %470 }
 0x1af   : > { %v479_v33 = vadd.f32 %v471_v32, %v463_v29  ;;  %485 = vst.msk [vmem:[%s952_s3 + $0x10] sm:$0xff] %vm482_vm2, %v480_v31 }
 0x1b0   : > { %v477_v36 = vpop.xlane.xlu0 %476 }
 0x1b1   : > { %484 = vst.msk [vmem:[%s952_s3 + $0x8] sm:$0xff] %vm482_vm2, %v479_v33  ;;  %v481_v37 = vadd.f32 %v477_v36, %v465_v34 }
 0x1b2   : > { %v507_v38 = vpop.xlane.xlu1 %506 }
 0x1b3   : > { %v513_v39 = vadd.f32 %v507_v38, %v489_v35  ;;  %486 = vst.msk [vmem:[%s952_s3 + $0x18] sm:$0xff] %vm482_vm2, %v481_v37 }
 0x1b4   : > { %v504_v41 = vpop.xlane.xlu0 %503 }
 0x1b5   : > { %517 = vst.msk [vmem:[%s953_s4 + $0x10] sm:$0xff] %vm482_vm2, %v513_v39  ;;  %v512_v42 = vadd.f32 %v504_v41, %v488_v40 }
 0x1b7   : > { %516 = vst.msk [vmem:[%s953_s4 + $0x8] sm:$0xff] %vm482_vm2, %v512_v42 }
 0x1b8   : > { %v510_v44 = vpop.xlane.xlu0 %509 }
 0x1b9   : > { %v514_v45 = vadd.f32 %v510_v44, %v490_v43 }
 0x1bb   : > { %518 = vst.msk [vmem:[%s953_s4 + $0x18] sm:$0xff] %vm482_vm2, %v514_v45 }
 0x1bc PF: > { %s15_s15 = sadd.s32 1, %s688_s15  }
 0x1bd   : > { %p12_p5 = scmp.ge.s32.totalorder %s15_s15, 4  }
 0x1bf   :  { %14 = sbr.rel (!%p12_p5) target bundleno = 1 (0x1), region = 70 }

</bundles_post_ra>
